<compile_context>
chip_gen: v7x
topology: tpu7x:2x2x1
jax: 0.10.0
libtpu: 0.0.40
codegen_flags: <defaults>
</compile_context>

<pallas_src>
import jax
import jax.numpy as jnp
from jax.experimental import pallas as pl
from jax.experimental.pallas import tpu as pltpu


def _round_up(a, b):
    return ((a + b - 1) // b) * b


def _vmem_limit_bytes():
    """Generation-aware scoped-VMEM limit (~3/4 of physical per-core VMEM):
    ~48 MiB on v7x (64 MiB physical), ~96 MiB on v5e/v6e (128 MiB)."""
    phys = 64 * 1024 * 1024                      # conservative default = v7x
    try:
        phys = int(pltpu.get_tpu_info().vmem_capacity_bytes)
    except Exception:
        pass
    return max(32 * 1024 * 1024, min((3 * phys) // 4, 128 * 1024 * 1024))


def _choose_tiles(M, K_pad, E_pad, out_bytes, budget):
    """Pick (tm, te).

    Priorities: fit the pipelined footprint in `budget`; keep tm as large as
    possible (>= 256 preferred for MXU cadence on v5e), shrinking the E tile
    before letting tm collapse; keep >= 2 grid steps over M (v7x dual-TC);
    prefer a tm that divides M so the M pad / post-slice can be skipped.
    """
    def need(tm, te):
        w_bufs = 1 if te == E_pad else 2         # constant index -> Buffered(1)
        return (2 * tm * K_pad * 2               # bf16 patches tile, 2 buffers
                + w_bufs * te * (K_pad * 2 + 4)  # bf16 weight + f32 bias
                + 2 * tm * te * out_bytes        # output tile, 2 buffers
                + tm * te * 4)                   # f32 dot-result temporary

    M16 = _round_up(max(M, 1), 16)
    tm_max = min(1024, M16)
    if M16 >= 32:                                # force >= 2 grid steps over M
        tm_max = min(tm_max, _round_up(M16 // 2, 16))

    def largest_tm(te):
        tm = tm_max
        while tm > 16 and need(tm, te) > budget:
            tm = max(16, (tm // 2 // 16) * 16)
        return tm

    te = E_pad
    tm = largest_tm(te)
    # VMEM-tight: shrink E (keeping 128-multiples, lane-dense) before letting
    # the M tile drop below 256 rows.
    while tm < 256 and M16 >= 256 and te > 256 and te % 256 == 0:
        te //= 2
        tm = largest_tm(te)

    # Prefer a tm that divides M exactly (skip the M pad copy and M slice);
    # accept at most a 2x reduction in tile size for it.
    if M % 16 == 0 and M % tm != 0:
        for t in range(tm - 16, tm // 2, -16):
            if M % t == 0:
                tm = t
                break
    return tm, te


def _patch_embed_kernel(p_ref, w_ref, b_ref, o_ref):
    # p_ref: (tm, Kp) bf16, w_ref: (Kp, te) bf16, b_ref: (1, te) f32,
    # o_ref: (tm, te).  One MXU matmul with f32 accumulation + VPU bias/cast.
    acc = jnp.dot(p_ref[...], w_ref[...], preferred_element_type=jnp.float32)
    o_ref[...] = (acc + b_ref[...]).astype(o_ref.dtype)


def _pallas_matmul(patches, w2d, b2d, *, tm, te, M_pad, K_pad, E_pad,
                   out_dtype, vmem_limit, single_buffer_const):
    grid_m = M_pad // tm
    grid_e = E_pad // te
    out_bytes = jnp.dtype(out_dtype).itemsize

    const_kwargs = {}
    if single_buffer_const and grid_e == 1:
        # Constant block index across the whole grid -> no double buffering.
        const_kwargs = dict(pipeline_mode=pl.Buffered(1))

    w_reads = grid_m if grid_e > 1 else 1
    cost = pl.CostEstimate(
        flops=2 * M_pad * K_pad * E_pad,
        bytes_accessed=(M_pad * K_pad * 2
                        + w_reads * K_pad * E_pad * 2
                        + E_pad * 4
                        + M_pad * E_pad * out_bytes),
        transcendentals=0,
    )

    return pl.pallas_call(
        _patch_embed_kernel,
        out_shape=jax.ShapeDtypeStruct((M_pad, E_pad), out_dtype),
        grid_spec=pltpu.PrefetchScalarGridSpec(
            num_scalar_prefetch=0,
            grid=(grid_m, grid_e),
            in_specs=[
                pl.BlockSpec((tm, K_pad), lambda i, j: (i, 0)),
                pl.BlockSpec((K_pad, te), lambda i, j: (0, j), **const_kwargs),
                pl.BlockSpec((1, te), lambda i, j: (0, j), **const_kwargs),
            ],
            out_specs=pl.BlockSpec((tm, te), lambda i, j: (i, j)),
        ),
        compiler_params=pltpu.CompilerParams(
            dimension_semantics=("parallel", "parallel"),   # dual-TC on v7x
            vmem_limit_bytes=vmem_limit,
        ),
        cost_estimate=cost,
    )(patches, w2d, b2d)


def patch_embed_forward(x, weight, bias, patch_size, out_dtype=None):
    """x: (B, C, H, W) NCHW.  weight: (E, C, ph, pw) (PyTorch Conv2d layout).
    bias: (E,).  Returns (B, num_patches, E) in `out_dtype` (default x.dtype;
    pass jnp.bfloat16 when the surrounding model runs in bf16 to halve the
    output HBM traffic on mem-bound v6e/v7x)."""
    B, C, H, W = x.shape
    E = weight.shape[0]
    ph, pw = patch_size
    nh, nw = H // ph, W // pw
    N = nh * nw
    K = C * ph * pw
    M = B * N

    out_dtype = x.dtype if out_dtype is None else jnp.dtype(out_dtype)
    out_bytes = jnp.dtype(out_dtype).itemsize

    # Lane-dense padding of K and E to multiples of 128 (zeros do not change
    # the contraction; extra output columns are sliced only if added).
    K_pad = _round_up(K, 128)
    E_pad = _round_up(E, 128)
    vmem_limit = _vmem_limit_bytes()
    tm, te = _choose_tiles(M, K_pad, E_pad, out_bytes, (vmem_limit * 7) // 8)
    M_pad = _round_up(M, tm)

    # --- Patch extraction (XLA glue).  Cast to bf16 FIRST so the expensive
    # 6-D transpose moves 2 B/elem instead of 4 and no extra astype copy is
    # emitted.  Flatten order (C, ph, pw) matches PyTorch Conv2d's
    # weight.reshape(E, C*ph*pw) contraction order.
    # TODO(synk): fuse this extraction into the Pallas pipeline (grid over
    # (B, nh) with an in-VMEM (C, ph, nw, pw) -> (nw, K) rearrange) to remove
    # the remaining HBM round-trip of the bf16 patches array; kept in XLA
    # because Mosaic's relayout of the small trailing (ph, pw) dims is not
    # robustly lowerable.
    xb = x.astype(jnp.bfloat16)
    patches = xb.reshape(B, C, nh, ph, nw, pw)
    patches = jnp.transpose(patches, (0, 2, 4, 1, 3, 5))   # (B, nh, nw, C, ph, pw)
    patches = patches.reshape(M, K)
    if M_pad > M or K_pad > K:
        patches = jnp.pad(patches, ((0, M_pad - M), (0, K_pad - K)))

    w2d = weight.reshape(E, K).T.astype(jnp.bfloat16)       # (K, E)
    if K_pad > K or E_pad > E:
        w2d = jnp.pad(w2d, ((0, K_pad - K), (0, E_pad - E)))
    b2d = bias.astype(jnp.float32).reshape(1, E)
    if E_pad > E:
        b2d = jnp.pad(b2d, ((0, 0), (0, E_pad - E)))

    kwargs = dict(tm=tm, te=te, M_pad=M_pad, K_pad=K_pad, E_pad=E_pad,
                  out_dtype=out_dtype, vmem_limit=vmem_limit)
    try:
        out = _pallas_matmul(patches, w2d, b2d,
                             single_buffer_const=True, **kwargs)
    except Exception:
        # pipeline_mode=pl.Buffered(1) unsupported on this jax build; fall
        # back to default double-buffered weight/bias (identical semantics).
        out = _pallas_matmul(patches, w2d, b2d,
                             single_buffer_const=False, **kwargs)

    # Slice padding only when padding was actually added (each slice is a full
    # HBM copy; standard ViT embed dims are already multiples of 128).
    if M_pad > M:
        out = out[:M]
    if E_pad > E:
        out = out[:, :E]
    return out.reshape(B, N, E)


if __name__ == "__main__":
    # Small PatchEmbed config: img_size=16, patch_size=4, in_chans=4, embed_dim=32
    B, C, H, W = 2, 4, 16, 16
    ph, pw = 4, 4
    E = 32

    key = jax.random.PRNGKey(0)
    kx, kw, kb = jax.random.split(key, 3)
    x = jax.random.normal(kx, (B, C, H, W), dtype=jnp.float32)
    weight = jax.random.normal(kw, (E, C, ph, pw), dtype=jnp.float32) * 0.02
    bias = jax.random.normal(kb, (E,), dtype=jnp.float32) * 0.02

    out = patch_embed_forward(x, weight, bias, (ph, pw))
    out = jax.block_until_ready(out)

    # Reference check against XLA strided conv (PyTorch Conv2d semantics).
    ref = jax.lax.conv_general_dilated(
        x, weight, window_strides=(ph, pw), padding="VALID",
        dimension_numbers=("NCHW", "OIHW", "NCHW"))
    ref = ref + bias[None, :, None, None]
    ref = ref.reshape(B, E, -1).transpose(0, 2, 1)          # flatten(2).transpose(1,2)

    assert out.shape == (B, (H // ph) * (W // pw), E)
    # bf16 MXU operands with f32 accumulation -> slightly loosened tolerance.
    assert jnp.allclose(out, ref, atol=2e-2, rtol=2e-2)

    print("KERNEL_OK")
</pallas_src>

<mosaic_0001>
module attributes {stable_mosaic.version = 11 : i64} {
  func.func @_patch_embed_kernel(%arg0: i32, %arg1: i32, %arg2: memref<16x128xbf16, #tpu.memory_space<vmem>>, %arg3: memref<128x128xbf16, #tpu.memory_space<vmem>>, %arg4: memref<1x128xf32, #tpu.memory_space<vmem>>, %arg5: memref<16x128xf32, #tpu.memory_space<vmem>>) attributes {dimension_semantics = [#tpu.dimension_semantics<parallel>, #tpu.dimension_semantics<parallel>], iteration_bounds = array<i64: 2, 1>, scalar_prefetch = 0 : i64, scratch_operands = 0 : i64, tpu.core_type = #tpu.core_type<tc>, window_params = [{transform_indices = @transform_0, window_bounds = array<i64: 16, 128>}, {pipeline_mode = #tpu.pipeline_mode<synchronous>, transform_indices = @transform_1, window_bounds = array<i64: 128, 128>}, {pipeline_mode = #tpu.pipeline_mode<synchronous>, transform_indices = @transform_2, window_bounds = array<i64: 1, 128>}, {transform_indices = @transform_3, window_bounds = array<i64: 16, 128>}]} {
    %c0 = arith.constant 0 : index
    %c0_0 = arith.constant 0 : index
    %0 = vector.load %arg2[%c0, %c0_0] : memref<16x128xbf16, #tpu.memory_space<vmem>>, vector<16x128xbf16>
    %c0_1 = arith.constant 0 : index
    %c0_2 = arith.constant 0 : index
    %1 = vector.load %arg3[%c0_1, %c0_2] : memref<128x128xbf16, #tpu.memory_space<vmem>>, vector<128x128xbf16>
    %cst = arith.constant dense<0.000000e+00> : vector<16x128xf32>
    %2 = tpu.matmul %0, %1, %cst {dimension_numbers = #tpu.dot_dimension_numbers<[1], [0], [0], [1], [0, 0, 1, 1], [], []>} : vector<16x128xbf16>, vector<128x128xbf16>, vector<16x128xf32> -> vector<16x128xf32>
    %c0_3 = arith.constant 0 : index
    %c0_4 = arith.constant 0 : index
    %3 = vector.load %arg4[%c0_3, %c0_4] : memref<1x128xf32, #tpu.memory_space<vmem>>, vector<1x128xf32>
    %4 = vector.broadcast %3 : vector<1x128xf32> to vector<16x128xf32>
    %5 = arith.addf %2, %4 : vector<16x128xf32>
    %c0_5 = arith.constant 0 : index
    %c0_6 = arith.constant 0 : index
    %6 = vector.load %arg5[%c0_5, %c0_6] : memref<16x128xf32, #tpu.memory_space<vmem>>, vector<16x128xf32>
    tpu.vector_store %arg5[%c0_5, %c0_6], %5 {strides = array<i32>} : memref<16x128xf32, #tpu.memory_space<vmem>>, vector<16x128xf32>,
    return
  }
  func.func @transform_0(%arg0: i32, %arg1: i32) -> (i32, i32) {
    %c0_i32 = arith.constant 0 : i32
    %c0_i32_0 = arith.constant 0 : i32
    return %arg0, %c0_i32 : i32, i32
  }
  func.func @transform_1(%arg0: i32, %arg1: i32) -> (i32, i32) {
    %c0_i32 = arith.constant 0 : i32
    %c0_i32_0 = arith.constant 0 : i32
    return %c0_i32, %arg1 : i32, i32
  }
  func.func @transform_2(%arg0: i32, %arg1: i32) -> (i32, i32) {
    %c0_i32 = arith.constant 0 : i32
    %c0_i32_0 = arith.constant 0 : i32
    return %c0_i32, %arg1 : i32, i32
  }
  func.func @transform_3(%arg0: i32, %arg1: i32) -> (i32, i32) {
    %c0_i32 = arith.constant 0 : i32
    return %arg0, %arg1 : i32, i32
  }
}

module attributes {stable_mosaic.version = 11 : i64} {
  func.func @_patch_embed_kernel(%arg0: i32, %arg1: i32, %arg2: memref<16x128xbf16, #tpu.memory_space<vmem>>, %arg3: memref<128x128xbf16, #tpu.memory_space<vmem>>, %arg4: memref<1x128xf32, #tpu.memory_space<vmem>>, %arg5: memref<16x128xf32, #tpu.memory_space<vmem>>) attributes {dimension_semantics = [#tpu.dimension_semantics<parallel>, #tpu.dimension_semantics<parallel>], iteration_bounds = array<i64: 2, 1>, scalar_prefetch = 0 : i64, scratch_operands = 0 : i64, tpu.core_type = #tpu.core_type<tc>, window_params = [{transform_indices = @transform_0, window_bounds = array<i64: 16, 128>}, {transform_indices = @transform_1, window_bounds = array<i64: 128, 128>}, {transform_indices = @transform_2, window_bounds = array<i64: 1, 128>}, {transform_indices = @transform_3, window_bounds = array<i64: 16, 128>}]} {
    %c0 = arith.constant 0 : index
    %c0_0 = arith.constant 0 : index
    %0 = vector.load %arg2[%c0, %c0_0] : memref<16x128xbf16, #tpu.memory_space<vmem>>, vector<16x128xbf16>
    %c0_1 = arith.constant 0 : index
    %c0_2 = arith.constant 0 : index
    %1 = vector.load %arg3[%c0_1, %c0_2] : memref<128x128xbf16, #tpu.memory_space<vmem>>, vector<128x128xbf16>
    %cst = arith.constant dense<0.000000e+00> : vector<16x128xf32>
    %2 = tpu.matmul %0, %1, %cst {dimension_numbers = #tpu.dot_dimension_numbers<[1], [0], [0], [1], [0, 0, 1, 1], [], []>} : vector<16x128xbf16>, vector<128x128xbf16>, vector<16x128xf32> -> vector<16x128xf32>
    %c0_3 = arith.constant 0 : index
    %c0_4 = arith.constant 0 : index
    %3 = vector.load %arg4[%c0_3, %c0_4] : memref<1x128xf32, #tpu.memory_space<vmem>>, vector<1x128xf32>
    %4 = vector.broadcast %3 : vector<1x128xf32> to vector<16x128xf32>
    %5 = arith.addf %2, %4 : vector<16x128xf32>
    %c0_5 = arith.constant 0 : index
    %c0_6 = arith.constant 0 : index
    %6 = vector.load %arg5[%c0_5, %c0_6] : memref<16x128xf32, #tpu.memory_space<vmem>>, vector<16x128xf32>
    tpu.vector_store %arg5[%c0_5, %c0_6], %5 {strides = array<i32>} : memref<16x128xf32, #tpu.memory_space<vmem>>, vector<16x128xf32>,
    return
  }
  func.func @transform_0(%arg0: i32, %arg1: i32) -> (i32, i32) {
    %c0_i32 = arith.constant 0 : i32
    %c0_i32_0 = arith.constant 0 : i32
    return %arg0, %c0_i32 : i32, i32
  }
  func.func @transform_1(%arg0: i32, %arg1: i32) -> (i32, i32) {
    %c0_i32 = arith.constant 0 : i32
    %c0_i32_0 = arith.constant 0 : i32
    return %c0_i32, %arg1 : i32, i32
  }
  func.func @transform_2(%arg0: i32, %arg1: i32) -> (i32, i32) {
    %c0_i32 = arith.constant 0 : i32
    %c0_i32_0 = arith.constant 0 : i32
    return %c0_i32, %arg1 : i32, i32
  }
  func.func @transform_3(%arg0: i32, %arg1: i32) -> (i32, i32) {
    %c0_i32 = arith.constant 0 : i32
    return %arg0, %arg1 : i32, i32
  }
}

</mosaic_0001>

<bundles_post_ra>
// kernel: tpu_custom_call.1
= control target key start
LH: loop header
LB: loop body
LE: loop exit
PB: predicated region body
PF: predicated region fallthrough
CT: control target
= control target key end

     0   :  { %8 = vsyncpa [#allocation3], 0  ;;  %s1040_s0 = inlined_call_operand.hbm [shape: bf16[32,128], index: 0, kind: input, shape index: {}]   ;;  %s1041_s1 = inlined_call_operand.hbm [shape: bf16[128,128], index: 1, kind: input, shape index: {}]   ;;  %s1042_s2 = inlined_call_operand.vmem [shape: f32[1,128], index: 2, kind: input, shape index: {}]   ;;  %s1043_s3 = inlined_call_operand.hbm [shape: f32[32,128], index: 3, kind: output, shape index: {}]  }
   0x1   :  { %10 = vsyncpa [#allocation3 + $0x1], 0 }
   0x2   :  { %11 = vsyncpa [#allocation6], 0 }
   0x3   :  { %12 = vsyncpa [#allocation4], 0 }
   0x4   :  { %14 = vsyncpa [#allocation4 + $0x1], 0  ;;  %s808_s12 = smov 0   ;;  %s810_s13 = smov 0  }
   0x5   :  { %s812_s14 = smov 0   ;;  %s814_s15 = smov 0  }
   0x6   :  { %s816_s16 = smov 0   ;;  %s818_s17 = smov 0  }
   0x7 LB: > { %s486_s18 = sadd.s32 4294967295, %s777_s17   ;;  %s487_s19 = sadd.s32 4294967294, %s777_s17   ;;  %s777_s17 = sphi %s818_s17, %s20_s17   ;;  %s773_s16 = sphi %s816_s16, %s1067_s16   ;;  %s769_s15 = sphi %s814_s15, %s1066_s15   ;;  %s765_s14 = sphi %s812_s14, %s1065_s14   ;;  %s761_s13 = sphi %s810_s13, %s1064_s13   ;;  %s757_s12 = sphi %s808_s12, %s1063_s12  }
   0x8   : > { %p52_p0 = scmp.ne.s32.totalorder %s761_s13, %s757_s12  ;;  %p842_p1 = scmp.eq.s32.totalorder %s486_s18, 0 }
   0x9   : > { %p846_p2 = scmp.eq.s32.totalorder %s486_s18, 1  ;;  %p136_p3 = scmp.eq.s32.totalorder %s487_s19, 1 }
   0xa   : > { %s1048_s20 = scalar_select %p842_p1, 1, 0 }
   0xb   : > { %s1049_s21 = scalar_select %p846_p2, 1, 0 }
   0xc   : > { %p852_p4 = por %p842_p1, %p52_p0  ;;  %p488_p5 = scmp.ge.s32.totalorder %s777_s17, 1 }
   0xd   : > { %p857_p6 = por %p136_p3, %p52_p0  ;;  %p143_p7 = scmp.lt.s32.totalorder %s777_s17, 3 }
   0xe   : > { %s1050_s22 = scalar_select %p852_p4, 1, 0 }
   0xf   : > { %s1051_s23 = scalar_select %p857_p6, 1, 0 }
  0x10   : > { %p862_p8 = pnand %p488_p5, %p143_p7  ;;  %s779_s25 = smov [#allocation5]  }
  0x11   : > { %s157_s26 = sshll.u32 %s779_s25, 4  ;;  %s32_s28 = sadd.s32 1, %s773_s16  ;;  %s158_s26 = int_to_ptr.vmem [resolvable:$true] %s157_s26 }
  0x12   : > { %s1052_s24 = scalar_select %p862_p8, 1, 0 }
  0x13   : > { %p553_p9 = pneg %p862_p8  ;;  %s633_s4 = scalar_lea.hbm %s1041_s1, 1024 }
  0x14   : > { %p634_p12 = scmp.ne.s32.totalorder %s1041_s1, %s633_s4  ;;  %p640_p5 = scmp.lt.u32.totalorder %s633_s4, %s1041_s1 }
  0x15   : > { %p871_p11 = pnand %p553_p9, %p842_p1 }
  0x17   : > { %p635_p13 = pneg %p871_p11 }
  0x19   : > { %p636_p0 = pnand %p635_p13, %p634_p12 }
  0x1b   : > { %p637_p3 = pneg %p636_p0 }
  0x1d   : > { %p642_p7 = pnand %p640_p5, %p637_p3 }
  0x1f   : > { %645 = shalt.err (!%p642_p7)
}
  0x20   : > { %s646_s9 = scalar_lea.vmem %s158_s26, 1024  ;;  %p654_p1 = scmp.lt.s32.totalorder %s158_s26, %s158_s26 }
  0x21   : > { %p647_p9 = scmp.ne.s32.totalorder %s158_s26, %s646_s9  ;;  %p655_p4 = scmp.lt.s32.totalorder %s646_s9, %s646_s9 }
  0x23   : > { %p649_p10 = pnand %p647_p9, %p635_p13  ;;  %p656_p8 = por %p655_p4, %p654_p1 }
  0x25   : > { %p650_p6 = pneg %p649_p10 }
  0x27   : > { %p657_p2 = pnand %p656_p8, %p650_p6 }
  0x29   : > { %660 = shalt.err (!%p657_p2)
}
  0x2a   : > { %s780_s10 = smov 64   ;;  %s781_s11 = smov 4  }
  0x2b   : > { %556 = dma.hbm_to_vmem [thread:$0]  (!%p871_p11), %s1041_s1, 1024, %s158_s26, [#allocation6], %s780_s10, %s780_s10, %s781_s11  }
  0x2c   : > { %p34_p1 = scmp.ge.s32.totalorder %s32_s28, 2  ;;  %s39_s25 = sadd.s32 1, %s765_s14 }
  0x2d   : > { %p46_p2 = scmp.ne.s32.totalorder %s765_s14, %s761_s13  ;;  %p47_p4 = scmp.eq.s32.totalorder %s777_s17, 0 }
  0x2e   : > { %s1069_s28 = smov (%p34_p1, %s32_s28), 0  ;;  %p1055_p8 = scmp.ne.s32.totalorder %s1049_s21, 0 }
  0x2f   : > { %p901_p6 = por %p47_p4, %p46_p2  ;;  %s36_s30 = ssub.s32 %s773_s16, %s1069_s28 }
  0x30   : > { %p907_p10 = por %p1055_p8, %p46_p2  ;;  %p566_p12 = scmp.lt.s32.totalorder %s777_s17, 2 }
  0x31   : > { %p37_p11 = scmp.eq.s32.totalorder %s36_s30, 0  ;;  %s177_s26 = sand.u32 1, %s765_s14  }
  0x32   : > { %s492_s4 = sshll.u32 %s177_s26, 3  ;;  %s514_s6 = sshll.u32 %s773_s16, 7 }
  0x33   : > { %s916_s5 = scalar_select %p37_p11, %s765_s14, %s39_s25  }
  0x34   : > { %s922_s9 = scalar_lea.hbm %s1040_s0, %s514_s6  ;;  %s181_s21 = scalar_lea.vmem [#allocation2], %s492_s4 }
  0x35   : > { %s188_s18 = sshll.u32 %s181_s21, 4  ;;  %p928_p13 = pnand %p566_p12, %p901_p6  ;;  %s924_s18 = int_to_ptr.vmem [resolvable:$true] %s188_s18 }
  0x36   : > { %s932_s25 = scalar_lea.sflag [#allocation3], %s177_s26  ;;  %s661_s30 = scalar_lea.hbm %s922_s9, 128 }
  0x37   : > { %p662_p0 = scmp.ne.s32.totalorder %s922_s9, %s661_s30  ;;  %p663_p3 = pneg %p928_p13 }
  0x38   : > { %s666_s29 = scalar_lea.hbm %s1040_s0, 256  ;;  %p667_p9 = scmp.lt.u32.totalorder %s922_s9, %s1040_s0 }
  0x39   : > { %p664_p5 = pnand %p663_p3, %p662_p0  ;;  %p668_p1 = scmp.lt.u32.totalorder %s666_s29, %s661_s30 }
  0x3a   : > { %p670_p4 = scmp.lt.u32.totalorder %s661_s30, %s922_s9 }
  0x3b   : > { %p665_p7 = pneg %p664_p5  ;;  %p669_p2 = por %p668_p1, %p667_p9 }
  0x3d   : > { %p671_p6 = por %p670_p4, %p669_p2 }
  0x3f   : > { %p672_p8 = pnand %p671_p6, %p665_p7 }
  0x41   : > { %675 = shalt.err (!%p672_p8)
}
  0x42   : > { %s676_s26 = scalar_lea.vmem %s924_s18, 128  ;;  %s782_s21 = smov [#allocation2]  }
  0x43   : > { %p677_p12 = scmp.ne.s32.totalorder %s924_s18, %s676_s26  ;;  %s681_s4 = sshll.u32 %s782_s21, 4  ;;  %s682_s4 = int_to_ptr.vmem [resolvable:$false] %s681_s4 }
  0x44   : > { %s683_s6 = scalar_lea.vmem %s682_s4, 256  ;;  %p684_p5 = scmp.lt.s32.totalorder %s924_s18, %s682_s4 }
  0x45   : > { %p679_p11 = pnand %p677_p12, %p663_p3  ;;  %p685_p9 = scmp.lt.s32.totalorder %s683_s6, %s676_s26 }
  0x47   : > { %p680_p0 = pneg %p679_p11  ;;  %p686_p1 = por %p685_p9, %p684_p5 }
  0x49   : > { %p687_p2 = pnand %p686_p1, %p680_p0 }
  0x4b   : > { %690 = shalt.err (!%p687_p2)
}
  0x4c   : > { %560 = dma.hbm_to_vmem [thread:$0]  (!%p928_p13), %s922_s9, 128, %s924_s18, %s932_s25, %s780_s10, %s780_s10, %s781_s11  }
  0x4d   : > { %p1058_p3 = scmp.ne.s32.totalorder %s1052_s24, 0 }
  0x4e   : > { %s966_s30 = sand.u32 (!%p1058_p3), 1, %s761_s13   ;;  %p1059_p7 = scmp.ne.s32.totalorder (!%p1058_p3), %s1050_s22, 0 }
  0x4f   : > { %200 = sbr.rel (%p1058_p3) target bundleno = 354 (0x162), region = 32  ;;  %s496_s29 = sshll.u32 (!%p1058_p3), %s966_s30, 3 }
  0x50   : > { %s203_s7 = scalar_lea.sflag (!%p1058_p3), [#allocation3], %s966_s30  ;;  %s970_s8 = scalar_lea.vmem (!%p1058_p3), [#allocation2], %s496_s29 }
  0x56   : > { %744 = dma.done.wait (%p1059_p7), %s203_s7, 128  }
  0x57   : > { %746 = vsyncadd (%p1059_p7), %s203_s7, 4294967168  ;;  %p1060_p13 = scmp.ne.s32.totalorder %s1048_s20, 0 }
  0x59   : > { %748 = dma.done.wait (%p1060_p13), [#allocation6], 1024  }
  0x5a   : > { %750 = vsyncadd (%p1060_p13), [#allocation6], 4294966272  ;;  %v783_v0 = vmov 0.0   ;;  %vm784_vm0 = vmmov 0   ;;  %v624_v1 = vld [vmem:[#allocation5] sm:$0xff]   ;;  %v625_v2 = vld [vmem:[#allocation5 + $0x8] sm:$0xff]  }
  0x5b   : > { %525 = vmatprep.subr.bf16.mxu0 %v783_v0  ;;  %541 = vmatprep.mubr.msk.bf16.mxu0 %vm784_vm0, %v783_v0  ;;  %v626_v3 = vld [vmem:[#allocation5 + $0x10] sm:$0xff]   ;;  %v627_v4 = vld [vmem:[#allocation5 + $0x18] sm:$0xff]   ;;  %v628_v5 = vld [vmem:[#allocation5 + $0x20] sm:$0xff]   ;;  %s498_s20 = sshll.u32 %s966_s30, 4  ;;  %s515_s9 = sshll.u32 %s769_s15, 8 }
  0x5c   : > { %526 = vmatpush3.bf16.msra.mxu0 %v624_v1  ;;  %v629_v6 = vld [vmem:[#allocation5 + $0x28] sm:$0xff]   ;;  %v630_v7 = vld [vmem:[#allocation5 + $0x30] sm:$0xff]   ;;  %v631_v8 = vld [vmem:[#allocation5 + $0x38] sm:$0xff]   ;;  %s235_s10 = scalar_lea.vmem [#allocation7], %s498_s20  ;;  %s991_s25 = scalar_lea.hbm %s1043_s3, %s515_s9 }
  0x5d   : > { %527 = vmatprep.subr.bf16.mxu0 %v783_v0  ;;  %v632_v9 = vld [vmem:[%s970_s8] sm:$0xff]   ;;  %s379_s11 = sshll.u32 %s235_s10, 4  ;;  %s365_s26 = scalar_lea.sflag [#allocation4], %s966_s30  ;;  %s986_s11 = int_to_ptr.vmem [resolvable:$true] %s379_s11 }
  0x5e   : > { %v499_v10 = vld [vmem:[%s1042_s2] ss:$0 sm:$0xff]  ;;  %s691_s15 = scalar_lea.vmem %s986_s11, 256  ;;  %s785_s21 = smov [#allocation7]  }
  0x5f   : > { %p692_p4 = scmp.ne.s32.totalorder %s986_s11, %s691_s15  ;;  %s695_s4 = sshll.u32 %s785_s21, 4  ;;  %s696_s4 = int_to_ptr.vmem [resolvable:$false] %s695_s4 }
  0x60   : > { %528 = vmatpush3.bf16.msra.mxu0 %v625_v2  ;;  %s697_s6 = scalar_lea.vmem %s696_s4, 512  ;;  %p698_p12 = scmp.lt.s32.totalorder %s986_s11, %s696_s4 }
  0x61   : > { %529 = vmatprep.subr.bf16.mxu0 %v783_v0  ;;  %p693_p6 = pnand %p692_p4, %p907_p10  ;;  %p699_p11 = scmp.lt.s32.totalorder %s697_s6, %s691_s15 }
  0x63   : > { %p694_p8 = pneg %p693_p6  ;;  %p700_p0 = por %p699_p11, %p698_p12 }
  0x64   : > { %530 = vmatpush3.bf16.msra.mxu0 %v626_v3 }
  0x65   : > { %531 = vmatprep.subr.bf16.mxu0 %v783_v0  ;;  %p701_p5 = pnand %p700_p0, %p694_p8 }
  0x68   : > { %532 = vmatpush3.bf16.msra.mxu0 %v627_v4 }
  0x69   : > { %533 = vmatprep.subr.bf16.mxu0 %v783_v0 }
  0x6c   : > { %534 = vmatpush3.bf16.msra.mxu0 %v628_v5 }
  0x6d   : > { %535 = vmatprep.subr.bf16.mxu0 %v783_v0 }
  0x70   : > { %536 = vmatpush3.bf16.msra.mxu0 %v629_v6 }
  0x71   : > { %537 = vmatprep.subr.bf16.mxu0 %v783_v0 }
  0x74   : > { %538 = vmatpush3.bf16.msra.mxu0 %v630_v7 }
  0x75   : > { %539 = vmatprep.subr.bf16.mxu0 %v783_v0 }
  0x78   : > { %540 = vmatpush3.bf16.msra.mxu0 %v631_v8 }
  0x7b   : > { %542 = vmatmul.mubr.bf16.vlgmr.msra.gmra.mrb[0].mxu0 %v632_v9 }
 0x14e   : > { %v355_v11 = vpop.f32.mrb[0].mxu0 }
 0x14f   : > { %v356_v12 = vadd.f32 %v499_v10, %v355_v11  ;;  %v543_v13 = vpop.f32.mrb[1].mxu0 }
 0x150   : > { %v358_v14 = vpop.f32.mrb[2].mxu0 }
 0x151   : > { %362 = vst [vmem:[%s235_s10] sm:$0xff] %v356_v12  ;;  %v359_v15 = vadd.f32 %v499_v10, %v358_v14  ;;  %v544_v16 = vpop.f32.mrb[3].mxu0 }
 0x153   : > { %363 = vst [vmem:[%s235_s10 + $0x8] sm:$0xff] %v359_v15 }
 0x154   : > { %704 = shalt.err (!%p701_p5)
}
 0x155   : > { %s705_s29 = scalar_lea.hbm %s991_s25, 256  ;;  %s709_s20 = scalar_lea.hbm %s1043_s3, 512 }
 0x156   : > { %p706_p9 = scmp.ne.s32.totalorder %s991_s25, %s705_s29  ;;  %p710_p3 = scmp.lt.u32.totalorder %s991_s25, %s1043_s3 }
 0x157   : > { %p711_p7 = scmp.lt.u32.totalorder %s709_s20, %s705_s29  ;;  %p713_p4 = scmp.lt.u32.totalorder %s705_s29, %s991_s25 }
 0x158   : > { %p707_p1 = pnand %p706_p9, %p907_p10 }
 0x159   : > { %p712_p13 = por %p711_p7, %p710_p3 }
 0x15a   : > { %p708_p2 = pneg %p707_p1 }
 0x15b   : > { %p714_p6 = por %p713_p4, %p712_p13 }
 0x15d   : > { %p715_p8 = pnand %p714_p6, %p708_p2 }
 0x15f   : > { %718 = shalt.err (!%p715_p8)
}
 0x160   : > { %s786_s10 = smov 128   ;;  %s787_s9 = smov 8  }
 0x161   : > { %551 = dma.vmem_to_hbm [thread:$0]  (%p907_p10), %s986_s11, 256, %s991_s25, %s365_s26, %s786_s10, %s786_s10, %s787_s9  }
 0x162 PF: > { %s394_s18 = sand.u32 1, %s757_s12   ;;  %p1061_p12 = scmp.ne.s32.totalorder %s1051_s23, 0 }
 0x163   : > { %p1062_p11 = scmp.ge.s32.totalorder %s777_s17, 2  ;;  %s395_s19 = scalar_lea.sflag [#allocation4], %s394_s18 }
 0x165   : > { %p562_p0 = pnand %p1062_p11, %p1061_p12 }
 0x167   : > { %752 = dma.done.wait (!%p562_p0), %s395_s19, 256  }
 0x168   : > { %754 = vsyncadd (!%p562_p0), %s395_s19, 4294967040  ;;  %s20_s17 = sadd.s32 1, %s777_s17   ;;  %s1063_s12 = smov %s761_s13 }
 0x169   : > { %p17_p5 = scmp.ge.s32.totalorder %s20_s17, 4   ;;  %s1064_s13 = smov %s765_s14 }
 0x16a   : > { %s1065_s14 = smov %s916_s5  ;;  %s1066_s15 = smov %s773_s16 }
 0x16b   : > { %s1067_s16 = smov %s1069_s28  ;;  %19 = sbr.rel (!%p17_p5) target bundleno = 7 (0x7), region = 85 }
 0x172   :  { %400 = vsyncpa [#allocation3], 1 }
 0x173   :  { %402 = vsyncpa [#allocation3 + $0x1], 1 }
 0x174   :  { %403 = vsyncpa [#allocation6], 1 }
 0x175   :  { %404 = vsyncpa [#allocation4], 1 }
 0x176   :  { %406 = vsyncpa [#allocation4 + $0x1], 1 }

// kernel: tpu_custom_call.1
= control target key start
LH: loop header
LB: loop body
LE: loop exit
PB: predicated region body
PF: predicated region fallthrough
CT: control target
= control target key end

     0   :  { %8 = vsyncpa [#allocation3], 0  ;;  %s1040_s0 = inlined_call_operand.hbm [shape: bf16[32,128], index: 0, kind: input, shape index: {}]   ;;  %s1041_s1 = inlined_call_operand.hbm [shape: bf16[128,128], index: 1, kind: input, shape index: {}]   ;;  %s1042_s2 = inlined_call_operand.vmem [shape: f32[1,128], index: 2, kind: input, shape index: {}]   ;;  %s1043_s3 = inlined_call_operand.hbm [shape: f32[32,128], index: 3, kind: output, shape index: {}]  }
   0x1   :  { %10 = vsyncpa [#allocation3 + $0x1], 0 }
   0x2   :  { %11 = vsyncpa [#allocation6], 0 }
   0x3   :  { %12 = vsyncpa [#allocation4], 0 }
   0x4   :  { %14 = vsyncpa [#allocation4 + $0x1], 0  ;;  %s808_s12 = smov 0   ;;  %s810_s13 = smov 0  }
   0x5   :  { %s812_s14 = smov 0   ;;  %s814_s15 = smov 0  }
   0x6   :  { %s816_s16 = smov 0   ;;  %s818_s17 = smov 0  }
   0x7 LB: > { %s486_s18 = sadd.s32 4294967295, %s777_s17   ;;  %s487_s19 = sadd.s32 4294967294, %s777_s17   ;;  %s777_s17 = sphi %s818_s17, %s20_s17   ;;  %s773_s16 = sphi %s816_s16, %s1067_s16   ;;  %s769_s15 = sphi %s814_s15, %s1066_s15   ;;  %s765_s14 = sphi %s812_s14, %s1065_s14   ;;  %s761_s13 = sphi %s810_s13, %s1064_s13   ;;  %s757_s12 = sphi %s808_s12, %s1063_s12  }
   0x8   : > { %p52_p0 = scmp.ne.s32.totalorder %s761_s13, %s757_s12  ;;  %p842_p1 = scmp.eq.s32.totalorder %s486_s18, 0 }
   0x9   : > { %p846_p2 = scmp.eq.s32.totalorder %s486_s18, 1  ;;  %p136_p3 = scmp.eq.s32.totalorder %s487_s19, 1 }
   0xa   : > { %s1048_s20 = scalar_select %p842_p1, 1, 0 }
   0xb   : > { %s1049_s21 = scalar_select %p846_p2, 1, 0 }
   0xc   : > { %p852_p4 = por %p842_p1, %p52_p0  ;;  %p488_p5 = scmp.ge.s32.totalorder %s777_s17, 1 }
   0xd   : > { %p857_p6 = por %p136_p3, %p52_p0  ;;  %p143_p7 = scmp.lt.s32.totalorder %s777_s17, 3 }
   0xe   : > { %s1050_s22 = scalar_select %p852_p4, 1, 0 }
   0xf   : > { %s1051_s23 = scalar_select %p857_p6, 1, 0 }
  0x10   : > { %p862_p8 = pnand %p488_p5, %p143_p7  ;;  %s779_s25 = smov [#allocation5]  }
  0x11   : > { %s157_s26 = sshll.u32 %s779_s25, 4  ;;  %s32_s28 = sadd.s32 1, %s773_s16  ;;  %s158_s26 = int_to_ptr.vmem [resolvable:$true] %s157_s26 }
  0x12   : > { %s1052_s24 = scalar_select %p862_p8, 1, 0 }
  0x13   : > { %p553_p9 = pneg %p862_p8  ;;  %s633_s4 = scalar_lea.hbm %s1041_s1, 1024 }
  0x14   : > { %p634_p12 = scmp.ne.s32.totalorder %s1041_s1, %s633_s4  ;;  %p640_p5 = scmp.lt.u32.totalorder %s633_s4, %s1041_s1 }
  0x15   : > { %p871_p11 = pnand %p553_p9, %p842_p1 }
  0x17   : > { %p635_p13 = pneg %p871_p11 }
  0x19   : > { %p636_p0 = pnand %p635_p13, %p634_p12 }
  0x1b   : > { %p637_p3 = pneg %p636_p0 }
  0x1d   : > { %p642_p7 = pnand %p640_p5, %p637_p3 }
  0x1f   : > { %645 = shalt.err (!%p642_p7)
}
  0x20   : > { %s646_s9 = scalar_lea.vmem %s158_s26, 1024  ;;  %p654_p1 = scmp.lt.s32.totalorder %s158_s26, %s158_s26 }
  0x21   : > { %p647_p9 = scmp.ne.s32.totalorder %s158_s26, %s646_s9  ;;  %p655_p4 = scmp.lt.s32.totalorder %s646_s9, %s646_s9 }
  0x23   : > { %p649_p10 = pnand %p647_p9, %p635_p13  ;;  %p656_p8 = por %p655_p4, %p654_p1 }
  0x25   : > { %p650_p6 = pneg %p649_p10 }
  0x27   : > { %p657_p2 = pnand %p656_p8, %p650_p6 }
  0x29   : > { %660 = shalt.err (!%p657_p2)
}
  0x2a   : > { %s780_s10 = smov 64   ;;  %s781_s11 = smov 4  }
  0x2b   : > { %556 = dma.hbm_to_vmem [thread:$0]  (!%p871_p11), %s1041_s1, 1024, %s158_s26, [#allocation6], %s780_s10, %s780_s10, %s781_s11  }
  0x2c   : > { %p34_p1 = scmp.ge.s32.totalorder %s32_s28, 2  ;;  %s39_s25 = sadd.s32 1, %s765_s14 }
  0x2d   : > { %p46_p2 = scmp.ne.s32.totalorder %s765_s14, %s761_s13  ;;  %p47_p4 = scmp.eq.s32.totalorder %s777_s17, 0 }
  0x2e   : > { %s1069_s28 = smov (%p34_p1, %s32_s28), 0  ;;  %p1055_p8 = scmp.ne.s32.totalorder %s1049_s21, 0 }
  0x2f   : > { %p901_p6 = por %p47_p4, %p46_p2  ;;  %s36_s30 = ssub.s32 %s773_s16, %s1069_s28 }
  0x30   : > { %p907_p10 = por %p1055_p8, %p46_p2  ;;  %p566_p12 = scmp.lt.s32.totalorder %s777_s17, 2 }
  0x31   : > { %p37_p11 = scmp.eq.s32.totalorder %s36_s30, 0  ;;  %s177_s26 = sand.u32 1, %s765_s14  }
  0x32   : > { %s492_s4 = sshll.u32 %s177_s26, 3  ;;  %s514_s6 = sshll.u32 %s773_s16, 7 }
  0x33   : > { %s916_s5 = scalar_select %p37_p11, %s765_s14, %s39_s25  }
  0x34   : > { %s922_s9 = scalar_lea.hbm %s1040_s0, %s514_s6  ;;  %s181_s21 = scalar_lea.vmem [#allocation2], %s492_s4 }
  0x35   : > { %s188_s18 = sshll.u32 %s181_s21, 4  ;;  %p928_p13 = pnand %p566_p12, %p901_p6  ;;  %s924_s18 = int_to_ptr.vmem [resolvable:$true] %s188_s18 }
  0x36   : > { %s932_s25 = scalar_lea.sflag [#allocation3], %s177_s26  ;;  %s661_s30 = scalar_lea.hbm %s922_s9, 128 }
  0x37   : > { %p662_p0 = scmp.ne.s32.totalorder %s922_s9, %s661_s30  ;;  %p663_p3 = pneg %p928_p13 }
  0x38   : > { %s666_s29 = scalar_lea.hbm %s1040_s0, 256  ;;  %p667_p9 = scmp.lt.u32.totalorder %s922_s9, %s1040_s0 }
  0x39   : > { %p664_p5 = pnand %p663_p3, %p662_p0  ;;  %p668_p1 = scmp.lt.u32.totalorder %s666_s29, %s661_s30 }
  0x3a   : > { %p670_p4 = scmp.lt.u32.totalorder %s661_s30, %s922_s9 }
  0x3b   : > { %p665_p7 = pneg %p664_p5  ;;  %p669_p2 = por %p668_p1, %p667_p9 }
  0x3d   : > { %p671_p6 = por %p670_p4, %p669_p2 }
  0x3f   : > { %p672_p8 = pnand %p671_p6, %p665_p7 }
  0x41   : > { %675 = shalt.err (!%p672_p8)
}
  0x42   : > { %s676_s26 = scalar_lea.vmem %s924_s18, 128  ;;  %s782_s21 = smov [#allocation2]  }
  0x43   : > { %p677_p12 = scmp.ne.s32.totalorder %s924_s18, %s676_s26  ;;  %s681_s4 = sshll.u32 %s782_s21, 4  ;;  %s682_s4 = int_to_ptr.vmem [resolvable:$false] %s681_s4 }
  0x44   : > { %s683_s6 = scalar_lea.vmem %s682_s4, 256  ;;  %p684_p5 = scmp.lt.s32.totalorder %s924_s18, %s682_s4 }
  0x45   : > { %p679_p11 = pnand %p677_p12, %p663_p3  ;;  %p685_p9 = scmp.lt.s32.totalorder %s683_s6, %s676_s26 }
  0x47   : > { %p680_p0 = pneg %p679_p11  ;;  %p686_p1 = por %p685_p9, %p684_p5 }
  0x49   : > { %p687_p2 = pnand %p686_p1, %p680_p0 }
  0x4b   : > { %690 = shalt.err (!%p687_p2)
}
  0x4c   : > { %560 = dma.hbm_to_vmem [thread:$0]  (!%p928_p13), %s922_s9, 128, %s924_s18, %s932_s25, %s780_s10, %s780_s10, %s781_s11  }
  0x4d   : > { %p1058_p3 = scmp.ne.s32.totalorder %s1052_s24, 0 }
  0x4e   : > { %s966_s30 = sand.u32 (!%p1058_p3), 1, %s761_s13   ;;  %p1059_p7 = scmp.ne.s32.totalorder (!%p1058_p3), %s1050_s22, 0 }
  0x4f   : > { %200 = sbr.rel (%p1058_p3) target bundleno = 354 (0x162), region = 32  ;;  %s496_s29 = sshll.u32 (!%p1058_p3), %s966_s30, 3 }
  0x50   : > { %s203_s7 = scalar_lea.sflag (!%p1058_p3), [#allocation3], %s966_s30  ;;  %s970_s8 = scalar_lea.vmem (!%p1058_p3), [#allocation2], %s496_s29 }
  0x56   : > { %744 = dma.done.wait (%p1059_p7), %s203_s7, 128  }
  0x57   : > { %746 = vsyncadd (%p1059_p7), %s203_s7, 4294967168  ;;  %p1060_p13 = scmp.ne.s32.totalorder %s1048_s20, 0 }
  0x59   : > { %748 = dma.done.wait (%p1060_p13), [#allocation6], 1024  }
  0x5a   : > { %750 = vsyncadd (%p1060_p13), [#allocation6], 4294966272  ;;  %v783_v0 = vmov 0.0   ;;  %vm784_vm0 = vmmov 0   ;;  %v624_v1 = vld [vmem:[#allocation5] sm:$0xff]   ;;  %v625_v2 = vld [vmem:[#allocation5 + $0x8] sm:$0xff]  }
  0x5b   : > { %525 = vmatprep.subr.bf16.mxu0 %v783_v0  ;;  %541 = vmatprep.mubr.msk.bf16.mxu0 %vm784_vm0, %v783_v0  ;;  %v626_v3 = vld [vmem:[#allocation5 + $0x10] sm:$0xff]   ;;  %v627_v4 = vld [vmem:[#allocation5 + $0x18] sm:$0xff]   ;;  %v628_v5 = vld [vmem:[#allocation5 + $0x20] sm:$0xff]   ;;  %s498_s20 = sshll.u32 %s966_s30, 4  ;;  %s515_s9 = sshll.u32 %s769_s15, 8 }
  0x5c   : > { %526 = vmatpush3.bf16.msra.mxu0 %v624_v1  ;;  %v629_v6 = vld [vmem:[#allocation5 + $0x28] sm:$0xff]   ;;  %v630_v7 = vld [vmem:[#allocation5 + $0x30] sm:$0xff]   ;;  %v631_v8 = vld [vmem:[#allocation5 + $0x38] sm:$0xff]   ;;  %s235_s10 = scalar_lea.vmem [#allocation7], %s498_s20  ;;  %s991_s25 = scalar_lea.hbm %s1043_s3, %s515_s9 }
  0x5d   : > { %527 = vmatprep.subr.bf16.mxu0 %v783_v0  ;;  %v632_v9 = vld [vmem:[%s970_s8] sm:$0xff]   ;;  %s379_s11 = sshll.u32 %s235_s10, 4  ;;  %s365_s26 = scalar_lea.sflag [#allocation4], %s966_s30  ;;  %s986_s11 = int_to_ptr.vmem [resolvable:$true] %s379_s11 }
  0x5e   : > { %v499_v10 = vld [vmem:[%s1042_s2] ss:$0 sm:$0xff]  ;;  %s691_s15 = scalar_lea.vmem %s986_s11, 256  ;;  %s785_s21 = smov [#allocation7]  }
  0x5f   : > { %p692_p4 = scmp.ne.s32.totalorder %s986_s11, %s691_s15  ;;  %s695_s4 = sshll.u32 %s785_s21, 4  ;;  %s696_s4 = int_to_ptr.vmem [resolvable:$false] %s695_s4 }
  0x60   : > { %528 = vmatpush3.bf16.msra.mxu0 %v625_v2  ;;  %s697_s6 = scalar_lea.vmem %s696_s4, 512  ;;  %p698_p12 = scmp.lt.s32.totalorder %s986_s11, %s696_s4 }
  0x61   : > { %529 = vmatprep.subr.bf16.mxu0 %v783_v0  ;;  %p693_p6 = pnand %p692_p4, %p907_p10  ;;  %p699_p11 = scmp.lt.s32.totalorder %s697_s6, %s691_s15 }
  0x63   : > { %p694_p8 = pneg %p693_p6  ;;  %p700_p0 = por %p699_p11, %p698_p12 }
  0x64   : > { %530 = vmatpush3.bf16.msra.mxu0 %v626_v3 }
  0x65   : > { %531 = vmatprep.subr.bf16.mxu0 %v783_v0  ;;  %p701_p5 = pnand %p700_p0, %p694_p8 }
  0x68   : > { %532 = vmatpush3.bf16.msra.mxu0 %v627_v4 }
  0x69   : > { %533 = vmatprep.subr.bf16.mxu0 %v783_v0 }
  0x6c   : > { %534 = vmatpush3.bf16.msra.mxu0 %v628_v5 }
  0x6d   : > { %535 = vmatprep.subr.bf16.mxu0 %v783_v0 }
  0x70   : > { %536 = vmatpush3.bf16.msra.mxu0 %v629_v6 }
  0x71   : > { %537 = vmatprep.subr.bf16.mxu0 %v783_v0 }
  0x74   : > { %538 = vmatpush3.bf16.msra.mxu0 %v630_v7 }
  0x75   : > { %539 = vmatprep.subr.bf16.mxu0 %v783_v0 }
  0x78   : > { %540 = vmatpush3.bf16.msra.mxu0 %v631_v8 }
  0x7b   : > { %542 = vmatmul.mubr.bf16.vlgmr.msra.gmra.mrb[0].mxu0 %v632_v9 }
 0x14e   : > { %v355_v11 = vpop.f32.mrb[0].mxu0 }
 0x14f   : > { %v356_v12 = vadd.f32 %v499_v10, %v355_v11  ;;  %v543_v13 = vpop.f32.mrb[1].mxu0 }
 0x150   : > { %v358_v14 = vpop.f32.mrb[2].mxu0 }
 0x151   : > { %362 = vst [vmem:[%s235_s10] sm:$0xff] %v356_v12  ;;  %v359_v15 = vadd.f32 %v499_v10, %v358_v14  ;;  %v544_v16 = vpop.f32.mrb[3].mxu0 }
 0x153   : > { %363 = vst [vmem:[%s235_s10 + $0x8] sm:$0xff] %v359_v15 }
 0x154   : > { %704 = shalt.err (!%p701_p5)
}
 0x155   : > { %s705_s29 = scalar_lea.hbm %s991_s25, 256  ;;  %s709_s20 = scalar_lea.hbm %s1043_s3, 512 }
 0x156   : > { %p706_p9 = scmp.ne.s32.totalorder %s991_s25, %s705_s29  ;;  %p710_p3 = scmp.lt.u32.totalorder %s991_s25, %s1043_s3 }
 0x157   : > { %p711_p7 = scmp.lt.u32.totalorder %s709_s20, %s705_s29  ;;  %p713_p4 = scmp.lt.u32.totalorder %s705_s29, %s991_s25 }
 0x158   : > { %p707_p1 = pnand %p706_p9, %p907_p10 }
 0x159   : > { %p712_p13 = por %p711_p7, %p710_p3 }
 0x15a   : > { %p708_p2 = pneg %p707_p1 }
 0x15b   : > { %p714_p6 = por %p713_p4, %p712_p13 }
 0x15d   : > { %p715_p8 = pnand %p714_p6, %p708_p2 }
 0x15f   : > { %718 = shalt.err (!%p715_p8)
}
 0x160   : > { %s786_s10 = smov 128   ;;  %s787_s9 = smov 8  }
 0x161   : > { %551 = dma.vmem_to_hbm [thread:$0]  (%p907_p10), %s986_s11, 256, %s991_s25, %s365_s26, %s786_s10, %s786_s10, %s787_s9  }
 0x162 PF: > { %s394_s18 = sand.u32 1, %s757_s12   ;;  %p1061_p12 = scmp.ne.s32.totalorder %s1051_s23, 0 }
 0x163   : > { %p1062_p11 = scmp.ge.s32.totalorder %s777_s17, 2  ;;  %s395_s19 = scalar_lea.sflag [#allocation4], %s394_s18 }
 0x165   : > { %p562_p0 = pnand %p1062_p11, %p1061_p12 }
 0x167   : > { %752 = dma.done.wait (!%p562_p0), %s395_s19, 256  }
 0x168   : > { %754 = vsyncadd (!%p562_p0), %s395_s19, 4294967040  ;;  %s20_s17 = sadd.s32 1, %s777_s17   ;;  %s1063_s12 = smov %s761_s13 }
 0x169   : > { %p17_p5 = scmp.ge.s32.totalorder %s20_s17, 4   ;;  %s1064_s13 = smov %s765_s14 }
 0x16a   : > { %s1065_s14 = smov %s916_s5  ;;  %s1066_s15 = smov %s773_s16 }
 0x16b   : > { %s1067_s16 = smov %s1069_s28  ;;  %19 = sbr.rel (!%p17_p5) target bundleno = 7 (0x7), region = 85 }
 0x172   :  { %400 = vsyncpa [#allocation3], 1 }
 0x173   :  { %402 = vsyncpa [#allocation3 + $0x1], 1 }
 0x174   :  { %403 = vsyncpa [#allocation6], 1 }
 0x175   :  { %404 = vsyncpa [#allocation4], 1 }
 0x176   :  { %406 = vsyncpa [#allocation4 + $0x1], 1 }

</bundles_post_ra>
